<compile_context>
chip_gen: v6e
topology: v6e:2x2x1
jax: 0.10.0
libtpu: 0.0.40
codegen_flags: <defaults>
</compile_context>

<pallas_src>
import jax
import jax.numpy as jnp
from jax import lax
from jax.experimental import pallas as pl
from jax.experimental.pallas import tpu as pltpu
import numpy as np

# -------- hyperparameters (small, consistent with the module) --------
ENC_HID_DIM = 32
DEC_HID_DIM = 32
SRC_LEN     = 8
BATCH       = 2

_VSPEC = pl.BlockSpec(memory_space=pltpu.MemorySpace.VMEM)


def _slab_layout(dec_hid, enc_hid2):
    """Row offsets of the packed parameter slab [rows, dec_hid]."""
    off_wh = 0                                   # w_h : rows [0, dec_hid)
    off_we = dec_hid                             # w_e : rows [dec_hid, dec_hid + enc_hid2)
    off_b  = dec_hid + enc_hid2                  # bias: 1 row
    off_v  = ((off_b + 1 + 7) // 8) * 8          # v   : 1 row, sublane-aligned
    rows   = off_v + 8
    return off_wh, off_we, off_b, off_v, rows


# ---------------------------------------------------------------------
# Fused Pallas kernel: projections + tanh + score + regroup + softmax
# ---------------------------------------------------------------------
def _attention_kernel(hidden_ref, enc_ref, w_ref, out_ref):
    B, D = hidden_ref.shape
    SB, E2 = enc_ref.shape
    S = SB // B                                                   # static
    _, _, OFF_B, OFF_V, _ = _slab_layout(D, E2)

    # static slices of the packed parameter slab (one DMA'd input instead of four)
    w_h  = w_ref[0:D, :]                                          # [D, D]
    w_e  = w_ref[D:OFF_B, :]                                      # [2E, D]
    bias = w_ref[OFF_B:OFF_B + 1, :]                              # [1, D]
    v_row = w_ref[OFF_V:OFF_V + 1, :]                             # [1, D]

    # (1) decoder-hidden projection + bias: hoisted, computed ONCE (PyTorch repeats it S times).
    hp = (jnp.dot(hidden_ref[...], w_h, preferred_element_type=jnp.float32)
          + bias)                                                 # [B, D]

    # (2) one lane-dense matmul over every (s, b) row of the (un-transposed) encoder outputs.
    ep = jnp.dot(enc_ref[...], w_e, preferred_element_type=jnp.float32)   # [S*B, D]

    # (3) broadcast hp to every src position. Rows are (s, b)-ordered, so stack S copies
    #     of the [B, D] block along sublanes (cheap static concat, no reshape/relayout).
    hp_rows = jnp.concatenate([hp] * S, axis=0)                   # [S*B, D]

    energy = jnp.tanh(ep + hp_rows)                               # [S*B, D]  (single EUP pass)

    # (4) score contraction: ONE rhs-transposed dot over all rows -> lane-dense [1, S*B]
    #     (replaces the per-batch loop of tiny dot_generals + row concatenates).
    scores_row = lax.dot_general(v_row, energy, (((1,), (1,)), ((), ())),
                                 preferred_element_type=jnp.float32)      # [1, S*B]

    # (5) regroup the flat (s, b)-ordered scores into [B, S] with one iota-mask matmul.
    #     at_sr[s, r] = 1 iff r // B == s ; ct_bs[b, r] = 1 iff r %  B == b
    #     (built without integer div/mod: r % B is recovered from the same mask)
    s_i = lax.broadcasted_iota(jnp.int32, (S, SB), 0)
    r_i = lax.broadcasted_iota(jnp.int32, (S, SB), 1)
    d = r_i - s_i * B
    sel = jnp.logical_and(d >= 0, d < B)                          # [S, S*B]
    at_sr = sel.astype(jnp.float32)
    b_of_r = jnp.sum(jnp.where(sel, d.astype(jnp.float32), 0.0),
                     axis=0, keepdims=True)                       # [1, S*B] = r % B
    b_i = lax.broadcasted_iota(jnp.int32, (B, SB), 0).astype(jnp.float32)
    ct_bs = (b_i == b_of_r).astype(jnp.float32)                   # [B, S*B]

    masked = at_sr * scores_row                                   # [S, S*B]
    scores = lax.dot_general(ct_bs, masked, (((1,), (1,)), ((), ())),
                             preferred_element_type=jnp.float32)  # [B, S]  (== transpose+reshape)

    # (6) numerically-stable softmax over src (lanes = fast reduce); reciprocal on the EUP.
    m = jnp.max(scores, axis=1, keepdims=True)
    e = jnp.exp(scores - m)
    denom = jnp.sum(e, axis=1, keepdims=True)
    out_ref[...] = e * pl.reciprocal(denom, approx=False)
    # NOTE: out is [2, 8] -> masked partial store; lane-dense layout only pays once
    # batch/timesteps are fused (per review), so semantics are kept as-is here.


@jax.jit
def attention_forward(params, hidden, encoder_outputs):
    """hidden: [batch, dec_hid]; encoder_outputs: [src_len, batch, 2*enc_hid]."""
    S, B, E2 = encoder_outputs.shape
    # merge leading dims only: copy-free reshape, NO HBM transpose of the dominant input
    enc_flat = encoder_outputs.reshape(S * B, E2)
    return pl.pallas_call(
        _attention_kernel,
        out_shape=jax.ShapeDtypeStruct((B, S), jnp.float32),
        in_specs=[_VSPEC, _VSPEC, _VSPEC],
        out_specs=_VSPEC,
    )(hidden, enc_flat, params["w_slab"])


# ---------------------------------------------------------------------
# Parameter init (PyTorch-like uniform(-1/sqrt(fan_in), 1/sqrt(fan_in))),
# packed into a single [rows, dec_hid] slab:
#   rows [0:D)      w_h  (acts on the repeated decoder hidden, first in the concat)
#   rows [D:D+2E)   w_e  (acts on encoder outputs)
#   row  D+2E       bias of attn Linear
#   row  OFF_V      v (nn.Linear(dec_hid, 1, bias=False)) stored as a row
# ---------------------------------------------------------------------
def init_params(key):
    k1, k2, k3, k4 = jax.random.split(key, 4)
    D, E2 = DEC_HID_DIM, 2 * ENC_HID_DIM
    in_dim = E2 + D
    k_attn = 1.0 / np.sqrt(in_dim)
    k_v = 1.0 / np.sqrt(D)
    w_h = jax.random.uniform(k1, (D, D), jnp.float32, -k_attn, k_attn)
    w_e = jax.random.uniform(k2, (E2, D), jnp.float32, -k_attn, k_attn)
    b   = jax.random.uniform(k3, (1, D), jnp.float32, -k_attn, k_attn)
    v   = jax.random.uniform(k4, (1, D), jnp.float32, -k_v, k_v)
    _, _, off_b, off_v, rows = _slab_layout(D, E2)
    slab = jnp.zeros((rows, D), jnp.float32)
    slab = (slab.at[0:D].set(w_h)
                .at[D:off_b].set(w_e)
                .at[off_b:off_b + 1].set(b)
                .at[off_v:off_v + 1].set(v))
    return {"w_slab": slab}


# ---------------------------------------------------------------------
# Pure-JAX reference (literal transcription of the PyTorch forward)
# ---------------------------------------------------------------------
def attention_ref(params, hidden, encoder_outputs):
    S, B, E2 = encoder_outputs.shape
    D = hidden.shape[1]
    _, _, off_b, off_v, _ = _slab_layout(D, E2)
    slab = params["w_slab"]
    w_h, w_e = slab[0:D], slab[D:off_b]
    b, v = slab[off_b], slab[off_v]
    hidden_rep = jnp.repeat(hidden[:, None, :], S, axis=1)            # [B, S, D]
    enc = jnp.transpose(encoder_outputs, (1, 0, 2))                   # [B, S, 2E]
    cat = jnp.concatenate([hidden_rep, enc], axis=2)                  # [B, S, D+2E]
    w_attn = jnp.concatenate([w_h, w_e], axis=0)                      # [D+2E, D]
    energy = jnp.tanh(cat @ w_attn + b)                               # [B, S, D]
    attention = jnp.einsum("bsd,d->bs", energy, v)                    # [B, S]
    return jax.nn.softmax(attention, axis=1)


if __name__ == "__main__":
    key = jax.random.PRNGKey(0)
    k_param, k_hid, k_enc = jax.random.split(key, 3)
    params = init_params(k_param)
    hidden = jax.random.normal(k_hid, (BATCH, DEC_HID_DIM), jnp.float32)
    encoder_outputs = jax.random.normal(k_enc, (SRC_LEN, BATCH, 2 * ENC_HID_DIM), jnp.float32)

    attn = jax.block_until_ready(attention_forward(params, hidden, encoder_outputs))

    # correctness vs. pure-JAX reference of the PyTorch module
    ref = attention_ref(params, hidden, encoder_outputs)
    np.testing.assert_allclose(np.asarray(attn), np.asarray(ref), rtol=1e-5, atol=1e-5)

    assert attn.shape == (BATCH, SRC_LEN)
    np.testing.assert_allclose(np.asarray(attn).sum(axis=1), np.ones(BATCH),
                               rtol=1e-5, atol=1e-5)
    print("KERNEL_OK")
</pallas_src>

<mosaic_0001>
module attributes {stable_mosaic.version = 11 : i64} {
  func.func @_attention_kernel(%arg0: memref<2x32xf32, #tpu.memory_space<vmem>>, %arg1: memref<16x64xf32, #tpu.memory_space<vmem>>, %arg2: memref<112x32xf32, #tpu.memory_space<vmem>>, %arg3: memref<2x8xf32, #tpu.memory_space<vmem>>) attributes {dimension_semantics = [], scalar_prefetch = 0 : i64, scratch_operands = 0 : i64, tpu.core_type = #tpu.core_type<tc>} {
    %c0 = arith.constant 0 : index
    %c0_0 = arith.constant 0 : index
    %0 = vector.load %arg2[%c0, %c0_0] : memref<112x32xf32, #tpu.memory_space<vmem>>, vector<32x32xf32>
    %c32 = arith.constant 32 : index
    %c0_1 = arith.constant 0 : index
    %1 = vector.load %arg2[%c32, %c0_1] : memref<112x32xf32, #tpu.memory_space<vmem>>, vector<64x32xf32>
    %c96 = arith.constant 96 : index
    %c0_2 = arith.constant 0 : index
    %2 = vector.load %arg2[%c96, %c0_2] : memref<112x32xf32, #tpu.memory_space<vmem>>, vector<1x32xf32>
    %c104 = arith.constant 104 : index
    %c0_3 = arith.constant 0 : index
    %3 = vector.load %arg2[%c104, %c0_3] : memref<112x32xf32, #tpu.memory_space<vmem>>, vector<1x32xf32>
    %c0_4 = arith.constant 0 : index
    %c0_5 = arith.constant 0 : index
    %4 = vector.load %arg0[%c0_4, %c0_5] : memref<2x32xf32, #tpu.memory_space<vmem>>, vector<2x32xf32>
    %cst = arith.constant dense<0.000000e+00> : vector<2x32xf32>
    %5 = tpu.matmul %4, %0, %cst {dimension_numbers = #tpu.dot_dimension_numbers<[1], [0], [0], [1], [0, 0, 1, 1], [], []>} : vector<2x32xf32>, vector<32x32xf32>, vector<2x32xf32> -> vector<2x32xf32>
    %6 = vector.broadcast %2 : vector<1x32xf32> to vector<2x32xf32>
    %7 = arith.addf %5, %6 : vector<2x32xf32>
    %c0_6 = arith.constant 0 : index
    %c0_7 = arith.constant 0 : index
    %8 = vector.load %arg1[%c0_6, %c0_7] : memref<16x64xf32, #tpu.memory_space<vmem>>, vector<16x64xf32>
    %cst_8 = arith.constant dense<0.000000e+00> : vector<16x32xf32>
    %9 = tpu.matmul %8, %1, %cst_8 {dimension_numbers = #tpu.dot_dimension_numbers<[1], [0], [0], [1], [0, 0, 1, 1], [], []>} : vector<16x64xf32>, vector<64x32xf32>, vector<16x32xf32> -> vector<16x32xf32>
    %10 = tpu.concatenate %7, %7, %7, %7, %7, %7, %7, %7 in 0 : vector<2x32xf32>, vector<2x32xf32>, vector<2x32xf32>, vector<2x32xf32>, vector<2x32xf32>, vector<2x32xf32>, vector<2x32xf32>, vector<2x32xf32> -> vector<16x32xf32>
    %11 = arith.addf %9, %10 : vector<16x32xf32>
    %12 = math.tanh %11 : vector<16x32xf32>
    %cst_9 = arith.constant dense<0.000000e+00> : vector<1x16xf32>
    %13 = tpu.matmul %3, %12, %cst_9 {dimension_numbers = #tpu.dot_dimension_numbers<[1], [1], [0], [0], [0, 0, 1, 0], [], []>} : vector<1x32xf32>, vector<16x32xf32>, vector<1x16xf32> -> vector<1x16xf32>
    %14 = tpu.iota {dimensions = array<i32: 0>} : vector<8x16xi32>
    %15 = tpu.iota {dimensions = array<i32: 1>} : vector<8x16xi32>
    %c2_i32 = arith.constant 2 : i32
    %16 = vector.broadcast %c2_i32 : i32 to vector<8x16xi32>
    %17 = arith.muli %14, %16 : vector<8x16xi32>
    %18 = arith.subi %15, %17 : vector<8x16xi32>
    %c0_i32 = arith.constant 0 : i32
    %19 = vector.broadcast %c0_i32 : i32 to vector<8x16xi32>
    %20 = arith.cmpi sge, %18, %19 : vector<8x16xi32>
    %c2_i32_10 = arith.constant 2 : i32
    %21 = vector.broadcast %c2_i32_10 : i32 to vector<8x16xi32>
    %22 = arith.cmpi slt, %18, %21 : vector<8x16xi32>
    %23 = arith.andi %20, %22 : vector<8x16xi1>
    %24 = arith.extui %23 : vector<8x16xi1> to vector<8x16xi32>
    %25 = arith.sitofp %24 : vector<8x16xi32> to vector<8x16xf32>
    %26 = arith.sitofp %18 : vector<8x16xi32> to vector<8x16xf32>
    %cst_11 = arith.constant 0.000000e+00 : f32
    %27 = vector.broadcast %cst_11 : f32 to vector<8x16xf32>
    %28 = arith.select %23, %26, %27 : vector<8x16xi1>, vector<8x16xf32>
    %cst_12 = arith.constant dense<0.000000e+00> : vector<16xf32>
    %29 = vector.multi_reduction <add>, %28, %cst_12 [0] : vector<8x16xf32> to vector<16xf32>
    %30 = vector.shape_cast %29 : vector<16xf32> to vector<1x16xf32>
    %31 = tpu.iota {dimensions = array<i32: 0>} : vector<2x16xi32>
    %32 = arith.sitofp %31 : vector<2x16xi32> to vector<2x16xf32>
    %33 = vector.broadcast %30 : vector<1x16xf32> to vector<2x16xf32>
    %34 = arith.cmpf oeq, %32, %33 : vector<2x16xf32>
    %35 = arith.extui %34 : vector<2x16xi1> to vector<2x16xi32>
    %36 = arith.sitofp %35 : vector<2x16xi32> to vector<2x16xf32>
    %37 = vector.broadcast %13 : vector<1x16xf32> to vector<8x16xf32>
    %38 = arith.mulf %25, %37 : vector<8x16xf32>
    %cst_13 = arith.constant dense<0.000000e+00> : vector<2x8xf32>
    %39 = tpu.matmul %36, %38, %cst_13 {dimension_numbers = #tpu.dot_dimension_numbers<[1], [1], [0], [0], [0, 0, 1, 0], [], []>} : vector<2x16xf32>, vector<8x16xf32>, vector<2x8xf32> -> vector<2x8xf32>
    %cst_14 = arith.constant dense<0xFF800000> : vector<2xf32>
    %40 = vector.multi_reduction <maximumf>, %39, %cst_14 [1] : vector<2x8xf32> to vector<2xf32>
    %41 = vector.shape_cast %40 : vector<2xf32> to vector<2x1xf32>
    %42 = vector.broadcast %41 : vector<2x1xf32> to vector<2x8xf32>
    %43 = arith.subf %39, %42 : vector<2x8xf32>
    %44 = math.exp %43 : vector<2x8xf32>
    %cst_15 = arith.constant dense<0.000000e+00> : vector<2xf32>
    %45 = vector.multi_reduction <add>, %44, %cst_15 [1] : vector<2x8xf32> to vector<2xf32>
    %46 = vector.shape_cast %45 : vector<2xf32> to vector<2x1xf32>
    %47 = tpu.reciprocal %46 : vector<2x1xf32> -> vector<2x1xf32>
    %48 = vector.broadcast %47 : vector<2x1xf32> to vector<2x8xf32>
    %49 = arith.mulf %44, %48 : vector<2x8xf32>
    %c0_16 = arith.constant 0 : index
    %c0_17 = arith.constant 0 : index
    %50 = vector.load %arg3[%c0_16, %c0_17] : memref<2x8xf32, #tpu.memory_space<vmem>>, vector<2x8xf32>
    tpu.vector_store %arg3[%c0_16, %c0_17], %49 {strides = array<i32>} : memref<2x8xf32, #tpu.memory_space<vmem>>, vector<2x8xf32>,
    return
  }
}

</mosaic_0001>

<bundles_post_ra>
// kernel: attention_forward.1
= control target key start
LH: loop header
LB: loop body
LE: loop exit
PB: predicated region body
PF: predicated region fallthrough
CT: control target
= control target key end

     0   :  { %v525_v3 = vmov 0.0   ;;  %s629_s0 = inlined_call_operand.vmem [shape: f32[2,32], index: 0, kind: input, shape index: {}]   ;;  %s630_s1 = inlined_call_operand.vmem [shape: f32[16,64], index: 1, kind: input, shape index: {}]   ;;  %s631_s2 = inlined_call_operand.vmem [shape: f32[112,32], index: 2, kind: input, shape index: {}]   ;;  %s632_s3 = inlined_call_operand.hbm [shape: f32[2,8], index: 3, kind: output, shape index: {}]  }
   0x1   :  { %v26_v0 = vld [vmem:[%s631_s2 + $0x58] sm:$0xff]  ;;  %v25_v2 = vld [vmem:[%s631_s2 + $0x50] sm:$0xff]  ;;  %450 = vmatprep.subr.mxu0 %v525_v3  ;;  %v24_v5 = vld [vmem:[%s631_s2 + $0x48] sm:$0xff] }
   0x2   :  { %v18_v1 = vld [vmem:[%s631_s2 + $0x18] sm:$0xff]  ;;  %461 = vmatprep.subr.mxu1 %v26_v0  ;;  %v17_v4 = vld [vmem:[%s631_s2 + $0x10] sm:$0xff]  ;;  %v16_v6 = vld [vmem:[%s631_s2 + $0x8] sm:$0xff] }
   0x3   :  { %451 = vmatpush3.msra.mxu0 %v18_v1  ;;  %462 = vmatpush3.msra.mxu1 %v26_v0  ;;  %v23_v7 = vld [vmem:[%s631_s2 + $0x40] sm:$0xff] }
   0x4   :  { %452 = vmatprep.subr.mxu0 %v525_v3  ;;  %463 = vmatprep.subr.mxu1 %v25_v2  ;;  %v15_v8 = vld [vmem:[%s631_s2] sm:$0xff] }
   0x5   :  { %453 = vmatpush3.msra.mxu0 %v17_v4  ;;  %464 = vmatpush3.msra.mxu1 %v25_v2 }
   0x6   :  { %454 = vmatprep.subr.mxu0 %v525_v3  ;;  %465 = vmatprep.subr.mxu1 %v24_v5 }
   0x7   :  { %8 = vsyncpa [#allocation3], 0  ;;  %455 = vmatpush3.msra.mxu0 %v16_v6  ;;  %466 = vmatpush3.msra.mxu1 %v24_v5  ;;  %v29_v9 = vld [vmem:[%s629_s0] sm:$0x3]  ;;  %vm34_vm0 = vcmask 261120   ;;  %v22_v10 = vld [vmem:[%s631_s2 + $0x38] sm:$0xff]  ;;  %v286_v33 = vlaneseq }
   0x8   :  { %456 = vmatprep.subr.mxu0 %v525_v3  ;;  %467 = vmatprep.subr.mxu1 %v23_v7  ;;  %v108_v11 = vld [vmem:[%s630_s1] sm:$0xff]  ;;  %vm123_vm1 = vcmask 523264   ;;  %vm526_vm2 = vmmov 0   ;;  %v21_v12 = vld [vmem:[%s631_s2 + $0x30] sm:$0xff]  ;;  %v20_v13 = vld [vmem:[%s631_s2 + $0x28] sm:$0xff]  ;;  %vm117_vm3 = vcmask 1041408  }
   0x9   :  { %457 = vmatpush3.msra.mxu0 %v15_v8  ;;  %458 = vmatprep.mubr.msk.f32.mxu0 %vm526_vm2, %v525_v3  ;;  %v19_v14 = vld [vmem:[%s631_s2 + $0x20] sm:$0xff]  ;;  %v109_v15 = vld [vmem:[%s630_s1 + $0x8] sm:$0xff]  ;;  %vm119_vm4 = vcmask 1043456   ;;  %vm121_vm5 = vcmask 1045504   ;;  %v287_v34 = vshrl.u32 %v286_v33, 7  ;;  %v289_v35 = vand.u32 127, %v286_v33 }
   0xa   :  { %468 = vmatpush3.msra.mxu1 %v23_v7  ;;  %459 = vmatmul.mubr.msk.f32.vlgmr.msra.gmra.mxu0 %vm34_vm0, %v29_v9  ;;  %v419_v16 = vld [vmem:[%s631_s2 + $0x60] ss:$0 sm:$0xff]  ;;  %v28_v32 = vld [vmem:[%s631_s2 + $0x68] sm:$0x1]  ;;  %vm299_vm9 = vcmask 130048   ;;  %vm392_vm11 = vcmask 58368  }
   0xb   :  { %469 = vmatprep.subr.mxu1 %v22_v10  ;;  %477 = vmatprep.mubr.msk.f32.mxu1 %vm123_vm1, %v108_v11  ;;  %v290_v36 = vmul.u32 2, %v287_v34  ;;  %v313_v46 = vsub.s32 0, %v287_v34  ;;  %v307_v48 = vcvt.s32.f32 %v287_v34  ;;  %s527_s2 = smov [#allocation2]  }
   0xc   :  { %470 = vmatpush3.msra.mxu1 %v22_v10  ;;  %480 = vmatprep.subr.mxu0 %v525_v3  ;;  %s411_s17 = sshll.u32 %s527_s2, 4  ;;  %s412_s17 = int_to_ptr.vmem [resolvable:$true] %s411_s17 }
   0xd   :  { %471 = vmatprep.subr.mxu1 %v21_v12  ;;  %484 = vmatprep.mubr.msk.f32.mxu0 %vm526_vm2, %v525_v3  ;;  %v291_v37 = vsub.s32 %v289_v35, %v290_v36  ;;  %s503_s18 = scalar_lea.vmem %s412_s17, 32  ;;  %p508_p1 = scmp.lt.s32.totalorder %s412_s17, %s412_s17 }
   0xe   :  { %472 = vmatpush3.msra.mxu1 %v21_v12  ;;  %p504_p0 = scmp.ne.s32.totalorder %s412_s17, %s503_s18  ;;  %p509_p2 = scmp.lt.s32.totalorder %s503_s18, %s503_s18 }
   0xf   :  { %473 = vmatprep.subr.mxu1 %v20_v13  ;;  %vm292_vm6 = vcmp.ge.s32.totalorder %v291_v37, 0  ;;  %vm293_vm7 = vcmp.lt.s32.totalorder %v291_v37, 2  ;;  %v297_v38 = vcvt.s32.f32 %v291_v37 }
  0x10   :  { %474 = vmatpush3.msra.mxu1 %v20_v13  ;;  %vm294_vm8 = vmand %vm292_vm6, %vm293_vm7  ;;  %p510_p3 = por %p509_p2, %p508_p1 }
  0x11   :  { %475 = vmatprep.subr.mxu1 %v19_v14  ;;  %v298_v39 = vsel %vm294_vm8, %v297_v38, 0.0  ;;  %v426_v50 = vsel %vm294_vm8, 1.0, %v525_v3 }
  0x12   :  { %476 = vmatpush3.msra.mxu1 %v19_v14  ;;  %v300_v40 = vsel %vm299_vm9, %v298_v39, 0.0  ;;  %p511_p4 = pnand %p510_p3, %p504_p0 }
  0x13   :  { %478 = vmatmul.mubr.msk.f32.vlgmr.msra.gmra.mxu1 %vm123_vm1, %v109_v15  ;;  %v301_v41 = vrot.slane %v300_v40, 4 }
  0x15   :  { %v302_v42 = vadd.f32 %v301_v41, %v300_v40 }
  0x17   :  { %v303_v43 = vrot.slane %v302_v42, 2 }
  0x19   :  { %v304_v44 = vadd.f32 %v303_v43, %v302_v42 }
  0x1b   :  { %v305_v45 = vrot.slane %v304_v44, 1 }
  0x1d   :  { %v306_v47 = vadd.f32 %v305_v45, %v304_v44 }
  0x1f   :  { %vm308_vm10 = vcmp.eq.f32.partialorder %v307_v48, %v306_v47 }
  0x20   :  { %v427_v54 = vsel %vm308_vm10, 1.0, %v525_v3 }
  0xca   :  { %v104_v17 = vpop.f32.mrf.mxu0 }
  0xcb   :  { %v105_v18 = vadd.f32 %v419_v16, %v104_v17 }
  0xcc   :  { %v460_v19 = vpop.f32.mrf.mxu0 }
  0xcd   :  { %v111_v20 = vrot.slane %v105_v18, 6  ;;  %v113_v21 = vrot.slane %v105_v18, 4  ;;  %v115_v22 = vrot.slane %v105_v18, 2 }
  0xcf   :  { %v118_v23 = vsel %vm117_vm3, %v105_v18, %v111_v20 }
  0xd0   :  { %v120_v24 = vsel %vm119_vm4, %v118_v23, %v113_v21 }
  0xd1   :  { %v122_v25 = vsel %vm121_vm5, %v120_v24, %v115_v22 }
  0xd3   :  { %v479_v26 = vpop.f32.mrf.mxu1 }
  0xd4   :  { %v202_v27 = vadd.f32 %v479_v26, %v122_v25 }
  0xd5   :  { %v196_v28 = vpop.f32.mrf.mxu1 }
  0xd6   :  { %495 = vtanh.f32 %v202_v27  ;;  %v197_v29 = vadd.f32 %v196_v28, %v122_v25 }
  0xd8   :  { %497 = vtanh.f32 %v197_v29 }
  0xe3   :  { %v496_v30 = vpop.eup %495 }
  0xe4   :  { %481 = vmatpush3.xpose.msk.msra.mxu0 %vm34_vm0, %v496_v30 }
  0xe5   :  { %482 = vmatprep.subr.mxu0 %v525_v3  ;;  %v498_v31 = vpop.eup %497 }
  0xe8   :  { %483 = vmatpush3.xpose.msk.msra.mxu0 %vm34_vm0, %v498_v31 }
  0xe9   :  { %487 = vmatprep.subr.mxu0 %v525_v3 }
  0xeb   :  { %485 = vmatmul.mubr.msk.f32.vlgmr.msra.gmra.mxu0 %vm34_vm0, %v28_v32 }
  0xec   :  { %489 = vmatprep.mubr.msk.f32.mxu0 %vm526_vm2, %v525_v3 }
 0x1ab   :  { %v282_v49 = vpop.f32.mrf.mxu0 }
 0x1ac   :  { %v314_v51 = vrot.slane %v282_v49, %v313_v46 }
 0x1ad   :  { %v486_v52 = vpop.f32.mrf.mxu0 }
 0x1ae   :  { %v315_v53 = vmul.f32 %v426_v50, %v314_v51 }
 0x1b0   :  { %488 = vmatpush3.xpose.msk.msra.mxu0 %vm299_vm9, %v315_v53 }
 0x1b3   :  { %490 = vmatmul.mubr.msk.f32.vlgmr.msra.gmra.mxu0 %vm299_vm9, %v427_v54 }
 0x273   :  { %v388_v55 = vpop.f32.mrf.mxu0 }
 0x274   :  { %v393_v56 = vsel %vm392_vm11, %v388_v55, -inf }
 0x275   :  { %394 = vmax.xlane.f32.xlu0 %v393_v56  ;;  %v491_v57 = vpop.f32.mrf.mxu0 }
 0x2fe   :  { %v395_v58 = vpop.xlane.xlu0 %394 }
 0x2ff   :  { %v396_v59 = vsub.f32 %v388_v55, %v395_v58 }
 0x301   :  { %v397_v60 = vmul.f32 1.442695, %v396_v59 }
 0x303   :  { %499 = vpow2.f32 %v397_v60 }
 0x310   :  { %v500_v61 = vpop.eup %499 }
 0x311   :  { %v399_v62 = vsel %vm392_vm11, %v500_v61, 0.0 }
 0x312   :  { %400 = vadd.xlane.f32.xlu0 %v399_v62 }
 0x39b   :  { %v401_v63 = vpop.xlane.xlu0 %400 }
 0x39c   :  { %501 = vrcp.f32 %v401_v63 }
 0x3a9   :  { %v502_v0 = vpop.eup %501 }
 0x3aa   :  { %v403_v1 = vmul.f32 %v502_v0, %v500_v61 }
 0x3ac   :  { %404 = vst.msk [vmem:[#allocation2] sm:$0x3] %vm392_vm11, %v403_v1 }
 0x3ad   :  { %514 = shalt.err (!%p511_p4)
}
 0x3ae   :  { %414 = dma.vmem_to_hbm [thread:$0]  %s412_s17, 32, %s632_s3, [#allocation3]  }
 0x3af   :  { %523 = dma.done.wait [#allocation3], 32  }
 0x3b0   :  { %524 = vsyncadd [#allocation3], 4294967264 }
 0x3b1   :  { %418 = vsyncpa [#allocation3], 1 }

</bundles_post_ra>
